<compile_context>
chip_gen: v6e
topology: v6e:2x2x1
jax: 0.10.0
libtpu: 0.0.40
codegen_flags: <defaults>
</compile_context>

<pallas_src>
import math
import functools

import jax
import jax.numpy as jnp
from jax.experimental import pallas as pl
from jax.experimental.pallas import tpu as pltpu

_LANE = 128
# ~2 MiB per block (in I/O dtype bytes): >=85% of HBM roofline on v6e for a
# streaming elementwise kernel, while 4x block bytes (double-buffered in+out)
# stays well under the default scoped VMEM on v5e/v6e/v7x.
_TARGET_BLOCK_BYTES = 2 * 1024 * 1024


def _sublane_multiple(dtype) -> int:
    # Sub-32-bit dtypes pack along sublanes: f32 tile (8,128), bf16 (16,128),
    # int8/fp8 (32,128).  Align block rows to the packed tile.
    itemsize = jnp.dtype(dtype).itemsize
    return 8 * max(1, 4 // itemsize)


def _gelu_kernel(x_ref, o_ref, *, approximate: str, compute_dtype):
    x = x_ref[...].astype(compute_dtype)
    if approximate == "sigmoid":
        y = jax.nn.sigmoid(1.702 * x) * x
    elif approximate == "tanh":
        # torch F.gelu(approximate='tanh'):
        # 0.5 * x * (1 + tanh(sqrt(2/pi) * (x + 0.044715 * x^3)))
        c = math.sqrt(2.0 / math.pi)
        y = 0.5 * x * (1.0 + jnp.tanh(c * (x + 0.044715 * x * x * x)))
    else:  # 'none' and 'erf' are the exact erf-based GELU
        xf = x.astype(jnp.float32)
        y = xf * 0.5 * (1.0 + jax.lax.erf(xf * (1.0 / math.sqrt(2.0))))
    o_ref[...] = y.astype(o_ref.dtype)


def gelu_pallas(x: jax.Array, approximate: str = "none") -> jax.Array:
    assert approximate in ["none", "tanh", "sigmoid", "erf"]
    orig_shape = x.shape
    orig_dtype = x.dtype
    n = x.size
    if n == 0:
        return x

    itemsize = jnp.dtype(orig_dtype).itemsize
    sublane = _sublane_multiple(orig_dtype)

    # Flatten to a lane-dense (rows, 128) slab.  Pad only when n is not a
    # multiple of 128 (rare path; padding/slicing costs an extra HBM copy).
    flat = x.reshape(-1)
    padded = (n % _LANE) != 0
    n_pad = pl.cdiv(n, _LANE) * _LANE
    if padded:
        flat = jnp.pad(flat, (0, n_pad - n))
    rows = n_pad // _LANE
    x2d = flat.reshape(rows, _LANE)

    # Block rows: ~2 MiB per block, sublane-aligned for the I/O dtype.
    # Partial last block is handled by the cdiv grid + Pallas masking.
    target_rows = max(sublane, _TARGET_BLOCK_BYTES // (_LANE * itemsize))
    br = min(target_rows, rows)
    br = max(sublane, (br // sublane) * sublane)
    grid = (pl.cdiv(rows, br),)

    # bf16 compute on chips with bf16 VALU/EUP (v6e/v7x); f32 otherwise.
    compute_dtype = jnp.bfloat16 if orig_dtype == jnp.bfloat16 else jnp.float32

    out2d = pl.pallas_call(
        functools.partial(_gelu_kernel, approximate=approximate,
                          compute_dtype=compute_dtype),
        out_shape=jax.ShapeDtypeStruct((rows, _LANE), orig_dtype),
        grid_spec=pltpu.PrefetchScalarGridSpec(
            num_scalar_prefetch=0,
            grid=grid,
            in_specs=[pl.BlockSpec((br, _LANE), lambda i: (i, 0))],
            out_specs=pl.BlockSpec((br, _LANE), lambda i: (i, 0)),
        ),
        compiler_params=pltpu.CompilerParams(
            dimension_semantics=("parallel",)),
    )(x2d)

    if padded:
        return out2d.reshape(-1)[:n].reshape(orig_shape)
    return out2d.reshape(orig_shape)


def _gelu_ref(x, approximate):
    xf = x.astype(jnp.float32)
    if approximate == "sigmoid":
        y = jax.nn.sigmoid(1.702 * xf) * xf
    elif approximate == "tanh":
        c = math.sqrt(2.0 / math.pi)
        y = 0.5 * xf * (1.0 + jnp.tanh(c * (xf + 0.044715 * xf ** 3)))
    else:
        y = xf * 0.5 * (1.0 + jax.lax.erf(xf / math.sqrt(2.0)))
    return y.astype(x.dtype)


if __name__ == "__main__":
    key = jax.random.PRNGKey(0)
    k0, k1 = jax.random.split(key)

    # NCHW input, same convention as the PyTorch module.
    x = jax.random.normal(k0, (2, 4, 16, 16), dtype=jnp.float32)
    # Ragged shape (n % 128 != 0) to exercise the pad + partial-block path.
    x_ragged = jax.random.normal(k1, (3, 5, 7, 11), dtype=jnp.float32)

    ok = True
    for mode in ["none", "tanh", "sigmoid", "erf"]:
        for xi in (x, x_ragged):
            out = jax.block_until_ready(gelu_pallas(xi, approximate=mode))
            ref = _gelu_ref(xi, mode)
            if out.shape != xi.shape or not jnp.allclose(out, ref,
                                                         atol=1e-5, rtol=1e-5):
                ok = False
                print(f"MISMATCH mode={mode} shape={xi.shape} max err="
                      f"{float(jnp.max(jnp.abs(out - ref)))}")

    if ok:
        print("KERNEL_OK")
</pallas_src>

<mosaic_0001>
module attributes {stable_mosaic.version = 11 : i64} {
  func.func @_gelu_kernel(%arg0: i32, %arg1: memref<16x128xf32, #tpu.memory_space<vmem>>, %arg2: memref<16x128xf32, #tpu.memory_space<vmem>>) attributes {dimension_semantics = [#tpu.dimension_semantics<parallel>], iteration_bounds = array<i64: 1>, scalar_prefetch = 0 : i64, scratch_operands = 0 : i64, tpu.core_type = #tpu.core_type<tc>, window_params = [{transform_indices = @transform_0, window_bounds = array<i64: 16, 128>}, {transform_indices = @transform_1, window_bounds = array<i64: 16, 128>}]} {
    %c0 = arith.constant 0 : index
    %c0_0 = arith.constant 0 : index
    %0 = vector.load %arg1[%c0, %c0_0] : memref<16x128xf32, #tpu.memory_space<vmem>>, vector<16x128xf32>
    %cst = arith.constant 5.000000e-01 : f32
    %1 = vector.broadcast %cst : f32 to vector<16x128xf32>
    %2 = arith.mulf %0, %1 : vector<16x128xf32>
    %cst_1 = arith.constant 0.707106769 : f32
    %3 = vector.broadcast %cst_1 : f32 to vector<16x128xf32>
    %4 = arith.mulf %0, %3 : vector<16x128xf32>
    %5 = math.erf %4 : vector<16x128xf32>
    %cst_2 = arith.constant 1.000000e+00 : f32
    %6 = vector.broadcast %cst_2 : f32 to vector<16x128xf32>
    %7 = arith.addf %6, %5 : vector<16x128xf32>
    %8 = arith.mulf %2, %7 : vector<16x128xf32>
    %c0_3 = arith.constant 0 : index
    %c0_4 = arith.constant 0 : index
    %9 = vector.load %arg2[%c0_3, %c0_4] : memref<16x128xf32, #tpu.memory_space<vmem>>, vector<16x128xf32>
    tpu.vector_store %arg2[%c0_3, %c0_4], %8 {strides = array<i32>} : memref<16x128xf32, #tpu.memory_space<vmem>>, vector<16x128xf32>,
    return
  }
  func.func @transform_0(%arg0: i32) -> (i32, i32) {
    %c0_i32 = arith.constant 0 : i32
    %c0_i32_0 = arith.constant 0 : i32
    return %arg0, %c0_i32 : i32, i32
  }
  func.func @transform_1(%arg0: i32) -> (i32, i32) {
    %c0_i32 = arith.constant 0 : i32
    %c0_i32_0 = arith.constant 0 : i32
    return %arg0, %c0_i32 : i32, i32
  }
}

</mosaic_0001>

<bundles_post_ra>
// kernel: tpu_custom_call.1
= control target key start
LH: loop header
LB: loop body
LE: loop exit
PB: predicated region body
PF: predicated region fallthrough
CT: control target
= control target key end

     0   :  { %6 = vsyncpa [#allocation3], 0  ;;  %s132_s0 = inlined_call_operand.hbm [shape: f32[16,128], index: 0, kind: input, shape index: {}]   ;;  %s133_s1 = inlined_call_operand.hbm [shape: f32[16,128], index: 1, kind: output, shape index: {}]  }
   0x1   :  { %7 = vsyncpa [#allocation4], 0  ;;  %s106_s6 = smov [#allocation2]  }
   0x2   :  { %s13_s7 = sshll.u32 %s106_s6, 4  ;;  %s14_s7 = int_to_ptr.vmem [resolvable:$true] %s13_s7 }
   0x3   :  { %s70_s8 = scalar_lea.vmem %s14_s7, 256  ;;  %p75_p1 = scmp.lt.s32.totalorder %s14_s7, %s14_s7 }
   0x4   :  { %p71_p0 = scmp.ne.s32.totalorder %s14_s7, %s70_s8  ;;  %p76_p2 = scmp.lt.s32.totalorder %s70_s8, %s70_s8 }
   0x6   :  { %p77_p3 = por %p76_p2, %p75_p1 }
   0x8   :  { %p78_p4 = pnand %p77_p3, %p71_p0 }
   0xa   :  { %81 = shalt.err (!%p78_p4)
}
   0xb   :  { %s107_s9 = smov 128   ;;  %s108_s10 = smov 8  }
   0xc   :  { %19 = dma.hbm_to_vmem [thread:$0]  %s132_s0, 256, %s14_s7, [#allocation3], %s107_s9, %s107_s9, %s108_s10  }
   0xd   :  { %102 = dma.done.wait [#allocation3], 256  }
   0xe   :  { %103 = vsyncadd [#allocation3], 4294967040  ;;  %v23_v0 = vld [vmem:[#allocation2] sm:$0xff]  ;;  %v24_v1 = vld [vmem:[#allocation2 + $0x8] sm:$0xff]  ;;  %s109_s13 = smov [#allocation5]  }
   0xf   :  { %v27_v2 = vmul.f32 0.70710677, %v23_v0  ;;  %v28_v3 = vmul.f32 0.70710677, %v24_v1  ;;  %v25_v4 = vmul.f32 0.5, %v23_v0  ;;  %v26_v6 = vmul.f32 0.5, %v24_v1 }
  0x10   :  { %s42_s14 = sshll.u32 %s109_s13, 4  ;;  %s43_s14 = int_to_ptr.vmem [resolvable:$true] %s42_s14 }
  0x11   :  { %58 = verf.f32 %v27_v2  ;;  %s82_s0 = scalar_lea.vmem %s43_s14, 256  ;;  %p87_p6 = scmp.lt.s32.totalorder %s43_s14, %s43_s14 }
  0x12   :  { %60 = verf.f32 %v28_v3  ;;  %p83_p5 = scmp.ne.s32.totalorder %s43_s14, %s82_s0  ;;  %p88_p7 = scmp.lt.s32.totalorder %s82_s0, %s82_s0 }
  0x14   :  { %p89_p8 = por %p88_p7, %p87_p6 }
  0x16   :  { %p90_p9 = pnand %p89_p8, %p83_p5 }
  0x1e   :  { %v59_v5 = vpop.eup %58 }
  0x1f   :  { %v61_v7 = vpop.eup %60  ;;  %v31_v8 = vadd.f32 1.0, %v59_v5 }
  0x20   :  { %v32_v9 = vadd.f32 1.0, %v61_v7 }
  0x21   :  { %v33_v10 = vmul.f32 %v31_v8, %v25_v4 }
  0x22   :  { %v34_v11 = vmul.f32 %v32_v9, %v26_v6 }
  0x23   :  { %35 = vst [vmem:[#allocation5] sm:$0xff] %v33_v10 }
  0x24   :  { %36 = vst [vmem:[#allocation5 + $0x8] sm:$0xff] %v34_v11 }
  0x25   :  { %93 = shalt.err (!%p90_p9)
}
  0x26   :  { %48 = dma.vmem_to_hbm [thread:$0]  %s43_s14, 256, %s133_s1, [#allocation4], %s107_s9, %s107_s9, %s108_s10  }
  0x27   :  { %104 = dma.done.wait [#allocation4], 256  }
  0x28   :  { %105 = vsyncadd [#allocation4], 4294967040 }
  0x29   :  { %52 = vsyncpa [#allocation3], 1 }
  0x2a   :  { %53 = vsyncpa [#allocation4], 1 }

</bundles_post_ra>
